<compile_context>
chip_gen: v7x
topology: tpu7x:2x2x1
jax: 0.10.0
libtpu: 0.0.40
codegen_flags: <defaults>
</compile_context>

<pallas_src>
import functools

import jax
import jax.numpy as jnp
from jax.experimental import pallas as pl
from jax.experimental.pallas import tpu as pltpu


def _round_up(a, b):
    return (a + b - 1) // b * b


def avg_max_pool_kernel(w_ref, x_ref, o_ref, *, C, L, RS):
    # w_ref: (6,) f32 in SMEM = Conv1d(1,2,3) weight flattened, avg taps
    #        pre-scaled by 1/C (so the channel SUM is used directly).
    # x_ref: (TN, C*L) input block, channels flattened into lanes.
    # o_ref: (TN, L) lane-dense output block.
    TN = o_ref.shape[0]

    # Boundary masks for the 3-tap "same" conv, hoisted once per block.
    lane = jax.lax.broadcasted_iota(jnp.int32, (RS, L), 1)
    left_ok = (lane >= 1).astype(jnp.float32)        # position l-1 exists
    right_ok = (lane < L - 1).astype(jnp.float32)    # position l+1 exists

    w0 = w_ref[0]; w1 = w_ref[1]; w2 = w_ref[2]
    w3 = w_ref[3]; w4 = w_ref[4]; w5 = w_ref[5]

    def sub_slab(i, carry):
        r = pl.multiple_of(i * RS, RS)

        # Channel-wise sum / max, one contiguous (RS, L) lane-slice at a time.
        x0 = x_ref[pl.ds(r, RS), pl.ds(0, L)].astype(jnp.float32)
        acc = x0
        mx = x0
        for c in range(1, C):                        # C is small & static
            xc = x_ref[pl.ds(r, RS), pl.ds(c * L, L)].astype(jnp.float32)
            acc = acc + xc
            mx = jnp.maximum(mx, xc)

        # Pre-combine the two channels per tap: 2 rolls / 2 masks instead of 4.
        left = w0 * acc + w3 * mx      # contributes at output l from position l-1
        mid = w1 * acc + w4 * mx
        right = w2 * acc + w5 * mx     # contributes at output l from position l+1

        # pltpu.roll only accepts non-negative shifts: +1, and L-1 (== -1 mod L).
        left_sh = pltpu.roll(left, shift=1, axis=1) * left_ok
        right_sh = pltpu.roll(right, shift=L - 1, axis=1) * right_ok

        o_ref[pl.ds(r, RS), :] = (left_sh + mid + right_sh).astype(o_ref.dtype)
        return carry

    jax.lax.fori_loop(0, TN // RS, sub_slab, 0, unroll=True)


def avg_max_pool(x, w, *, block_n=None):
    """x: (N, C, L); w: Conv1d weight of shape (1, 2, 3). Returns (N, L)."""
    N, C, L = x.shape
    assert w.shape == (1, 2, 3)

    # Fold the mean's 1/C into the three avg-tap weights (free, host side).
    scale = jnp.array([1.0 / C] * 3 + [1.0] * 3, jnp.float32)
    w_flat = w.reshape(-1).astype(jnp.float32) * scale        # (6,) scalars -> SMEM

    # Flatten channels into lanes (free row-major reshape): dense DMA tiles,
    # no 4->8 sublane padding, channel access becomes a contiguous lane slice.
    x2 = x.reshape(N, C * L)

    # Batch-tile size: this kernel is pure HBM bandwidth, so take the largest
    # tile a modest VMEM budget allows, but keep >= 2 grid steps when possible
    # so v7x's two TensorCores both get work via dimension_semantics.
    if block_n is None:
        bytes_per_row = (C + 1) * L * x.dtype.itemsize         # input + output rows
        budget = 8 << 20                                        # per-buffer budget
        tn_cap = max(8, min(512, (budget // (2 * bytes_per_row)) // 8 * 8))
        tn = min(tn_cap, _round_up(pl.cdiv(N, 2), 8))
    else:
        tn = _round_up(min(block_n, N), 8)
    tn = max(8, tn)

    # Row sub-slab size inside the kernel (bounds vreg pressure for big tiles).
    RS = 32 if tn % 32 == 0 else (16 if tn % 16 == 0 else 8)

    grid = (pl.cdiv(N, tn),)
    kernel = functools.partial(avg_max_pool_kernel, C=C, L=L, RS=RS)

    return pl.pallas_call(
        kernel,
        out_shape=jax.ShapeDtypeStruct((N, L), x.dtype),
        grid=grid,
        in_specs=[
            pl.BlockSpec(memory_space=pltpu.MemorySpace.SMEM),   # weights, resident
            pl.BlockSpec((tn, C * L), lambda i: (i, 0)),         # dense batch tile
        ],
        out_specs=pl.BlockSpec((tn, L), lambda i: (i, 0)),       # lane-dense output
        compiler_params=pltpu.CompilerParams(
            dimension_semantics=("parallel",),
            vmem_limit_bytes=32 << 20,
        ),
    )(w_flat, x2)


def reference(x, w):
    """Plain-JAX reference mirroring the PyTorch module."""
    avg = jnp.mean(x, axis=1)
    mx = jnp.max(x, axis=1)
    stacked = jnp.stack([avg, mx], axis=1)                       # (N, 2, L)
    out = jax.lax.conv_general_dilated(
        stacked, w, window_strides=(1,), padding=((1, 1),),
        dimension_numbers=("NCH", "OIH", "NCH"))
    return out[:, 0, :]


if __name__ == "__main__":
    key = jax.random.PRNGKey(0)
    kx, kw = jax.random.split(key)

    # Small shapes consistent with the module: batch, channels, sequence length.
    N, C, L = 16, 4, 128
    x = jax.random.normal(kx, (N, C, L), jnp.float32)

    # PyTorch Conv1d default init: U(-1/sqrt(fan_in), 1/sqrt(fan_in)), fan_in = 2*3.
    bound = 1.0 / jnp.sqrt(jnp.float32(2 * 3))
    w = jax.random.uniform(kw, (1, 2, 3), jnp.float32, -bound, bound)

    out = avg_max_pool(x, w)
    out = jax.block_until_ready(out)

    ref = reference(x, w)
    assert out.shape == (N, L), out.shape
    assert jnp.allclose(out, ref, rtol=1e-4, atol=1e-4), float(jnp.abs(out - ref).max())
    print("KERNEL_OK")
</pallas_src>

<mosaic_0001>
module attributes {stable_mosaic.version = 11 : i64} {
  func.func @avg_max_pool_kernel(%arg0: i32, %arg1: memref<6xf32, #tpu.memory_space<smem>>, %arg2: memref<8x512xf32, #tpu.memory_space<vmem>>, %arg3: memref<8x128xf32, #tpu.memory_space<vmem>>) attributes {dimension_semantics = [#tpu.dimension_semantics<parallel>], iteration_bounds = array<i64: 2>, scalar_prefetch = 0 : i64, scratch_operands = 0 : i64, tpu.core_type = #tpu.core_type<tc>, window_params = [{transform_indices = @transform_0, window_bounds = array<i64: 6>}, {transform_indices = @transform_1, window_bounds = array<i64: 8, 512>}, {transform_indices = @transform_2, window_bounds = array<i64: 8, 128>}]} {
    %0 = tpu.iota {dimensions = array<i32: 1>} : vector<8x128xi32>
    %c1_i32 = arith.constant 1 : i32
    %1 = vector.broadcast %c1_i32 : i32 to vector<8x128xi32>
    %2 = arith.cmpi sge, %0, %1 : vector<8x128xi32>
    %3 = arith.extui %2 : vector<8x128xi1> to vector<8x128xi32>
    %4 = arith.sitofp %3 : vector<8x128xi32> to vector<8x128xf32>
    %c127_i32 = arith.constant 127 : i32
    %5 = vector.broadcast %c127_i32 : i32 to vector<8x128xi32>
    %6 = arith.cmpi slt, %0, %5 : vector<8x128xi32>
    %7 = arith.extui %6 : vector<8x128xi1> to vector<8x128xi32>
    %8 = arith.sitofp %7 : vector<8x128xi32> to vector<8x128xf32>
    %c0 = arith.constant 0 : index
    %9 = memref.load %arg1[%c0] : memref<6xf32, #tpu.memory_space<smem>>
    %c1 = arith.constant 1 : index
    %10 = memref.load %arg1[%c1] : memref<6xf32, #tpu.memory_space<smem>>
    %c2 = arith.constant 2 : index
    %11 = memref.load %arg1[%c2] : memref<6xf32, #tpu.memory_space<smem>>
    %c3 = arith.constant 3 : index
    %12 = memref.load %arg1[%c3] : memref<6xf32, #tpu.memory_space<smem>>
    %c4 = arith.constant 4 : index
    %13 = memref.load %arg1[%c4] : memref<6xf32, #tpu.memory_space<smem>>
    %c5 = arith.constant 5 : index
    %14 = memref.load %arg1[%c5] : memref<6xf32, #tpu.memory_space<smem>>
    %c0_i32 = arith.constant 0 : i32
    %c8_i32 = arith.constant 8 : i32
    %15 = arith.muli %c0_i32, %c8_i32 : i32
    %16 = tpu.assume_multiple %15, 8 : i32
    %17 = arith.index_cast %16 : i32 to index
    %c0_0 = arith.constant 0 : index
    %18 = vector.load %arg2[%17, %c0_0] : memref<8x512xf32, #tpu.memory_space<vmem>>, vector<8x128xf32>
    %19 = arith.index_cast %16 : i32 to index
    %c128 = arith.constant 128 : index
    %20 = vector.load %arg2[%19, %c128] : memref<8x512xf32, #tpu.memory_space<vmem>>, vector<8x128xf32>
    %21 = arith.addf %18, %20 : vector<8x128xf32>
    %22 = arith.maximumf %18, %20 : vector<8x128xf32>
    %23 = arith.index_cast %16 : i32 to index
    %c256 = arith.constant 256 : index
    %24 = vector.load %arg2[%23, %c256] : memref<8x512xf32, #tpu.memory_space<vmem>>, vector<8x128xf32>
    %25 = arith.addf %21, %24 : vector<8x128xf32>
    %26 = arith.maximumf %22, %24 : vector<8x128xf32>
    %27 = arith.index_cast %16 : i32 to index
    %c384 = arith.constant 384 : index
    %28 = vector.load %arg2[%27, %c384] : memref<8x512xf32, #tpu.memory_space<vmem>>, vector<8x128xf32>
    %29 = arith.addf %25, %28 : vector<8x128xf32>
    %30 = arith.maximumf %26, %28 : vector<8x128xf32>
    %31 = vector.broadcast %9 : f32 to vector<8x128xf32>
    %32 = arith.mulf %31, %29 : vector<8x128xf32>
    %33 = vector.broadcast %12 : f32 to vector<8x128xf32>
    %34 = arith.mulf %33, %30 : vector<8x128xf32>
    %35 = arith.addf %32, %34 : vector<8x128xf32>
    %36 = vector.broadcast %10 : f32 to vector<8x128xf32>
    %37 = arith.mulf %36, %29 : vector<8x128xf32>
    %38 = vector.broadcast %13 : f32 to vector<8x128xf32>
    %39 = arith.mulf %38, %30 : vector<8x128xf32>
    %40 = arith.addf %37, %39 : vector<8x128xf32>
    %41 = vector.broadcast %11 : f32 to vector<8x128xf32>
    %42 = arith.mulf %41, %29 : vector<8x128xf32>
    %43 = vector.broadcast %14 : f32 to vector<8x128xf32>
    %44 = arith.mulf %43, %30 : vector<8x128xf32>
    %45 = arith.addf %42, %44 : vector<8x128xf32>
    %c1_i32_1 = arith.constant 1 : i32
    %46 = tpu.dynamic_rotate %35 by %c1_i32_1 dim 1 : vector<8x128xf32>, i32 -> vector<8x128xf32>
    %47 = arith.mulf %46, %4 : vector<8x128xf32>
    %c127_i32_2 = arith.constant 127 : i32
    %48 = tpu.dynamic_rotate %45 by %c127_i32_2 dim 1 : vector<8x128xf32>, i32 -> vector<8x128xf32>
    %49 = arith.mulf %48, %8 : vector<8x128xf32>
    %50 = arith.addf %47, %40 : vector<8x128xf32>
    %51 = arith.addf %50, %49 : vector<8x128xf32>
    %52 = arith.index_cast %16 : i32 to index
    %c0_3 = arith.constant 0 : index
    %53 = vector.load %arg3[%52, %c0_3] : memref<8x128xf32, #tpu.memory_space<vmem>>, vector<8x128xf32>
    tpu.vector_store %arg3[%52, %c0_3], %51 {strides = array<i32>} : memref<8x128xf32, #tpu.memory_space<vmem>>, vector<8x128xf32>,
    %c1_i32_4 = arith.constant 1 : i32
    return
  }
  func.func @transform_0(%arg0: i32) -> i32 {
    %c0_i32 = arith.constant 0 : i32
    %c0_i32_0 = arith.constant 0 : i32
    return %c0_i32 : i32
  }
  func.func @transform_1(%arg0: i32) -> (i32, i32) {
    %c0_i32 = arith.constant 0 : i32
    %c0_i32_0 = arith.constant 0 : i32
    return %arg0, %c0_i32 : i32, i32
  }
  func.func @transform_2(%arg0: i32) -> (i32, i32) {
    %c0_i32 = arith.constant 0 : i32
    %c0_i32_0 = arith.constant 0 : i32
    return %arg0, %c0_i32 : i32, i32
  }
}

</mosaic_0001>

<bundles_post_ra>
// kernel: tpu_custom_call.1
= control target key start
LH: loop header
LB: loop body
LE: loop exit
PB: predicated region body
PF: predicated region fallthrough
CT: control target
= control target key end

     0   :  { %7 = vsyncpa [#allocation5], 0  ;;  %s744_s0 = inlined_call_operand.hbm [shape: f32[6], index: 0, kind: input, shape index: {}]   ;;  %s745_s1 = inlined_call_operand.hbm [shape: f32[16,512], index: 1, kind: input, shape index: {}]   ;;  %s746_s2 = inlined_call_operand.hbm [shape: f32[16,128], index: 2, kind: output, shape index: {}]  }
   0x1   :  { %8 = vsyncpa [#allocation3], 0 }
   0x2   :  { %10 = vsyncpa [#allocation3 + $0x1], 0 }
   0x3   :  { %11 = vsyncpa [#allocation4], 0 }
   0x4   :  { %13 = vsyncpa [#allocation4 + $0x1], 0  ;;  %s538_s9 = smov 0   ;;  %s540_s10 = smov 0  }
   0x5   :  { %s542_s11 = smov 0   ;;  %s544_s12 = smov 0  }
   0x6 LB: > { %s559_s13 = sadd.s32 4294967295, %s515_s12   ;;  %s319_s14 = sadd.s32 4294967294, %s515_s12   ;;  %s515_s12 = sphi %s544_s12, %s767_s12   ;;  %s511_s11 = sphi %s542_s11, %s766_s11   ;;  %s507_s10 = sphi %s540_s10, %s765_s10   ;;  %s503_s9 = sphi %s538_s9, %s764_s9  }
   0x7   : > { %p60_p0 = scmp.ne.s32.totalorder %s507_s10, %s503_s9  ;;  %p747_p1 = scmp.eq.s32.totalorder %s559_s13, 0 }
   0x8   : > { %p90_p3 = scmp.eq.s32.totalorder %s319_s14, 1  ;;  %p320_p5 = scmp.ge.s32.totalorder %s515_s12, 1 }
   0x9   : > { %p568_p4 = por %p747_p1, %p60_p0  ;;  %p97_p7 = scmp.lt.s32.totalorder %s515_s12, 3 }
   0xa   : > { %p573_p6 = por %p90_p3, %p60_p0  ;;  %s584_s18 = sadd.s32 1, %s515_s12  }
   0xb   : > { %s750_s15 = scalar_select %p568_p4, 1, 0 }
   0xc   : > { %s751_s16 = scalar_select %p573_p6, 1, 0 }
   0xd   : > { %p578_p8 = pnand %p320_p5, %p97_p7  ;;  %s44_s19 = ssub.s32 %s515_s12, %s584_s18 }
   0xe   : > { %s47_s20 = sadd.s32 1, %s511_s11  ;;  %p597_p12 = scmp.eq.s32.totalorder %s44_s19, 0 }
   0xf   : > { %p350_p10 = pneg %p578_p8  ;;  %p54_p13 = scmp.ne.s32.totalorder %s511_s11, %s507_s10 }
  0x10   : > { %p55_p0 = scmp.eq.s32.totalorder %s515_s12, 0  ;;  %p363_p3 = scmp.lt.s32.totalorder %s515_s12, 2 }
  0x11   : > { %p593_p11 = pnand %p350_p10, %p747_p1  ;;  %s402_s25 = scalar_lea.hbm %s744_s0, 16 }
  0x12   : > { %p403_p5 = scmp.ne.s32.totalorder %s744_s0, %s402_s25  ;;  %p409_p1 = scmp.lt.u32.totalorder %s402_s25, %s744_s0 }
  0x13   : > { %p404_p7 = pneg %p593_p11 }
  0x15   : > { %p405_p10 = pnand %p404_p7, %p403_p5 }
  0x17   : > { %p406_p9 = pneg %p405_p10 }
  0x19   : > { %p411_p2 = pnand %p409_p1, %p406_p9 }
  0x1b   : > { %414 = shalt.err (!%p411_p2)
}
  0x1c   : > { %s517_s30 = smov [#allocation2]   ;;  %p56_p1 = por %p55_p0, %p54_p13 }
  0x1d   : > { %353 = dma.hbm_to_smem (!%p593_p11), %s744_s0, 16, %s517_s30, [#allocation5]  }
  0x1e   : > { %s624_s5 = scalar_select %p597_p12, %s511_s11, %s47_s20  }
  0x1f   : > { %p755_p2 = scmp.eq.s32.totalorder %s559_s13, 1  ;;  %s119_s7 = sand.u32 1, %s511_s11  }
  0x20   : > { %s341_s8 = sshll.u32 %s515_s12, 9  ;;  %s323_s14 = sshll.u32 %s119_s7, 5 }
  0x21   : > { %p636_p9 = por %p755_p2, %p54_p13  ;;  %s645_s23 = scalar_lea.hbm %s745_s1, %s341_s8 }
  0x22   : > { %s123_s20 = scalar_lea.vmem [#allocation6], %s323_s14  ;;  %p649_p11 = pnand %p363_p3, %p56_p1 }
  0x23   : > { %s756_s6 = scalar_select %p636_p9, 1, 0 }
  0x24   : > { %s131_s22 = sshll.u32 %s123_s20, 4  ;;  %s120_s25 = scalar_lea.sflag [#allocation3], %s119_s7  ;;  %s653_s22 = int_to_ptr.vmem [resolvable:$true] %s131_s22 }
  0x25   : > { %s415_s26 = scalar_lea.hbm %s645_s23, 512  ;;  %p417_p13 = pneg %p649_p11 }
  0x26   : > { %p416_p12 = scmp.ne.s32.totalorder %s645_s23, %s415_s26  ;;  %s420_s29 = scalar_lea.hbm %s745_s1, 1024 }
  0x27   : > { %p421_p3 = scmp.lt.u32.totalorder %s645_s23, %s745_s1  ;;  %p422_p7 = scmp.lt.u32.totalorder %s420_s29, %s415_s26 }
  0x28   : > { %p418_p0 = pnand %p417_p13, %p416_p12  ;;  %p424_p1 = scmp.lt.u32.totalorder %s415_s26, %s645_s23 }
  0x29   : > { %p423_p10 = por %p422_p7, %p421_p3 }
  0x2a   : > { %p419_p5 = pneg %p418_p0 }
  0x2b   : > { %p425_p2 = por %p424_p1, %p423_p10 }
  0x2d   : > { %p426_p6 = pnand %p425_p2, %p419_p5 }
  0x2f   : > { %429 = shalt.err (!%p426_p6)
}
  0x30   : > { %s430_s4 = scalar_lea.vmem %s653_s22, 512  ;;  %s518_s7 = smov [#allocation6]  }
  0x31   : > { %p431_p12 = scmp.ne.s32.totalorder %s653_s22, %s430_s4  ;;  %s435_s8 = sshll.u32 %s518_s7, 4  ;;  %s436_s8 = int_to_ptr.vmem [resolvable:$false] %s435_s8 }
  0x32   : > { %s437_s14 = scalar_lea.vmem %s436_s8, 1024  ;;  %p438_p4 = scmp.lt.s32.totalorder %s653_s22, %s436_s8 }
  0x33   : > { %p433_p0 = pnand %p431_p12, %p417_p13  ;;  %p439_p3 = scmp.lt.s32.totalorder %s437_s14, %s430_s4 }
  0x35   : > { %p434_p9 = pneg %p433_p0  ;;  %p440_p7 = por %p439_p3, %p438_p4 }
  0x37   : > { %p441_p10 = pnand %p440_p7, %p434_p9 }
  0x39   : > { %444 = shalt.err (!%p441_p10)
}
  0x3a   : > { %357 = dma.hbm_to_vmem [thread:$0]  (!%p649_p11), %s645_s23, 512, %s653_s22, %s120_s25  }
  0x3b   : > { %140 = sbr.rel (%p578_p8) target bundleno = 221 (0xdd), region = 28  ;;  %p758_p6 = scmp.eq.s32.totalorder (!%p578_p8), %s559_s13, 0 }
  0x42   : > { %490 = dma.done.wait (%p758_p6), [#allocation5], 16   ;;  %p759_p13 = pmov %p758_p6 }
  0x43   : > { %s687_s19 = sand.u32 1, %s507_s10   ;;  %p760_p4 = scmp.ne.s32.totalorder %s750_s15, 0 }
  0x44   : > { %492 = vsyncadd (%p759_p13), [#allocation5], 4294967280  ;;  %s328_s21 = sshll.u32 %s687_s19, 5  ;;  %s147_s20 = scalar_lea.sflag [#allocation3], %s687_s19 }
  0x45   : > { %s150_s24 = scalar_lea.vmem [#allocation6], %s328_s21 }
  0x46   : > { %494 = dma.done.wait (%p760_p4), %s147_s20, 512  }
  0x47   : > { %496 = vsyncadd (%p760_p4), %s147_s20, 4294966784 }
  0x48   : > { %155 = sfence }
  0x49   : > { %s180_s17 = sld [smem:[#allocation2]]  ;;  %s334_s23 = sld [smem:[#allocation2 + $0x3]]  ;;  %v189_v0 = vld [vmem:[%s150_s24] sm:$0xff]  ;;  %v190_v1 = vld [vmem:[%s150_s24 + $0x8] sm:$0xff]  ;;  %v193_v4 = vld [vmem:[%s150_s24 + $0x10] sm:$0xff]  ;;  %v172_v25 = vlaneseq  ;;  %v521_v27 = vmov 0.0  }
  0x4a   : > { %v191_v2 = vadd.f32 %v190_v1, %v189_v0  ;;  %v192_v3 = vmax.f32 %v189_v0, %v190_v1  ;;  %s333_s22 = sld [smem:[#allocation2 + $0x2]]  ;;  %v196_v5 = vld [vmem:[%s150_s24 + $0x18] sm:$0xff]  ;;  %s336_s25 = sld [smem:[#allocation2 + $0x5]] }
  0x4b   : > { %s332_s26 = sld [smem:[#allocation2 + $0x1]]  ;;  %s335_s27 = sld [smem:[#allocation2 + $0x4]]  ;;  %v173_v26 = vand.u32 127, %v172_v25 }
  0x4c   : > { %v194_v6 = vadd.f32 %v193_v4, %v191_v2  ;;  %v195_v7 = vmax.f32 %v192_v3, %v193_v4  ;;  %s519_s15 = smov 1   ;;  %s520_s28 = smov 127  }
  0x4d   : > { %vm174_vm0 = vcmp.ge.s32.totalorder %v173_v26, 1  ;;  %s329_s29 = sshll.u32 %s687_s19, 3  ;;  %vm177_vm1 = vcmp.lt.s32.totalorder %v173_v26, 127  ;;  %s338_s30 = sshll.u32 %s559_s13, 7 }
  0x4e   : > { %v197_v8 = vadd.f32 %v196_v5, %v194_v6  ;;  %v198_v9 = vmax.f32 %v195_v7, %v196_v5  ;;  %v330_v28 = vsel %vm174_vm0, 1.0, %v521_v27  ;;  %v331_v31 = vsel %vm177_vm1, 1.0, %v521_v27  ;;  %s171_s3 = scalar_lea.vmem [#allocation7], %s329_s29  ;;  %s700_s14 = scalar_lea.hbm %s746_s2, %s338_s30 }
  0x4f   : > { %v199_v10 = vstv %s180_s17  ;;  %v201_v11 = vstv %s334_s23  ;;  %s237_s4 = sshll.u32 %s171_s3, 4  ;;  %s224_s21 = scalar_lea.sflag [#allocation4], %s687_s19  ;;  %s702_s4 = int_to_ptr.vmem [resolvable:$true] %s237_s4 }
  0x50   : > { %v200_v12 = vmul.f32 %v199_v10, %v197_v8  ;;  %v202_v13 = vmul.f32 %v201_v11, %v198_v9  ;;  %v209_v14 = vstv %s333_s22  ;;  %v211_v16 = vstv %s336_s25  ;;  %s445_s20 = scalar_lea.vmem %s702_s4, 128  ;;  %p761_p9 = scmp.ne.s32.totalorder %s756_s6, 0 }
  0x51   : > { %v210_v15 = vmul.f32 %v209_v14, %v197_v8  ;;  %v212_v18 = vmul.f32 %v211_v16, %v198_v9  ;;  %v204_v19 = vstv %s332_s26  ;;  %v206_v20 = vstv %s335_s27  ;;  %p446_p8 = scmp.ne.s32.totalorder %s702_s4, %s445_s20  ;;  %s522_s13 = smov [#allocation7]  }
  0x52   : > { %v203_v17 = vadd.f32 %v202_v13, %v200_v12  ;;  %v205_v21 = vmul.f32 %v204_v19, %v197_v8  ;;  %v207_v22 = vmul.f32 %v206_v20, %v198_v9  ;;  %s449_s24 = sshll.u32 %s522_s13, 4  ;;  %s450_s24 = int_to_ptr.vmem [resolvable:$false] %s449_s24 }
  0x53   : > { %v213_v23 = vadd.f32 %v212_v18, %v210_v15  ;;  %p447_p11 = pnand %p446_p8, %p761_p9  ;;  %s451_s17 = scalar_lea.vmem %s450_s24, 256 }
  0x54   : > { %214 = vrot.lane.b32.xlu0 %v203_v17, %s519_s15  ;;  %v208_v24 = vadd.f32 %v207_v22, %v205_v21  ;;  %p452_p1 = scmp.lt.s32.totalorder %s702_s4, %s450_s24  ;;  %p453_p2 = scmp.lt.s32.totalorder %s451_s17, %s445_s20 }
  0x55   : > { %p448_p5 = pneg %p447_p11 }
  0x56   : > { %p454_p12 = por %p453_p2, %p452_p1 }
  0x58   : > { %217 = vrot.lane.b32.xlu0 %v213_v23, %s520_s28  ;;  %p455_p0 = pnand %p454_p12, %p448_p5 }
  0xc6   : > { %v215_v29 = vpop.permute.xlu0 %214 }
  0xc7   : > { %v216_v30 = vmul.f32 %v330_v28, %v215_v29 }
  0xc9   : > { %v220_v33 = vadd.f32 %v216_v30, %v208_v24 }
  0xca   : > { %v218_v32 = vpop.permute.xlu0 %217 }
  0xcb   : > { %v219_v34 = vmul.f32 %v331_v31, %v218_v32 }
  0xcd   : > { %v221_v35 = vadd.f32 %v220_v33, %v219_v34 }
  0xcf   : > { %222 = vst [vmem:[%s171_s3] sm:$0xff] %v221_v35 }
  0xd0   : > { %458 = shalt.err (!%p455_p0)
}
  0xd1   : > { %s459_s19 = scalar_lea.hbm %s700_s14, 128  ;;  %s463_s25 = scalar_lea.hbm %s746_s2, 256 }
  0xd2   : > { %p460_p3 = scmp.ne.s32.totalorder %s700_s14, %s459_s19  ;;  %p464_p6 = scmp.lt.u32.totalorder %s700_s14, %s746_s2 }
  0xd3   : > { %p465_p13 = scmp.lt.u32.totalorder %s463_s25, %s459_s19  ;;  %p467_p8 = scmp.lt.u32.totalorder %s459_s19, %s700_s14 }
  0xd4   : > { %p461_p7 = pnand %p460_p3, %p761_p9 }
  0xd5   : > { %p466_p4 = por %p465_p13, %p464_p6 }
  0xd6   : > { %p462_p10 = pneg %p461_p7 }
  0xd7   : > { %p468_p11 = por %p467_p8, %p466_p4 }
  0xd9   : > { %p469_p5 = pnand %p468_p11, %p462_p10 }
  0xdb   : > { %472 = shalt.err (!%p469_p5)
}
  0xdc   : > { %348 = dma.vmem_to_hbm [thread:$0]  (%p761_p9), %s702_s4, 128, %s700_s14, %s224_s21  }
  0xdd PF: > { %s249_s15 = sand.u32 1, %s503_s9   ;;  %p762_p1 = scmp.ne.s32.totalorder %s751_s16, 0 }
  0xde   : > { %p763_p2 = scmp.ge.s32.totalorder %s515_s12, 2  ;;  %s250_s28 = scalar_lea.sflag [#allocation4], %s249_s15 }
  0xe0   : > { %p359_p12 = pnand %p763_p2, %p762_p1 }
  0xe2   : > { %498 = dma.done.wait (!%p359_p12), %s250_s28, 128  }
  0xe3   : > { %500 = vsyncadd (!%p359_p12), %s250_s28, 4294967168  ;;  %p16_p0 = scmp.ge.s32.totalorder %s584_s18, 4   ;;  %s764_s9 = smov %s507_s10 }
  0xe4   : > { %s765_s10 = smov %s511_s11  ;;  %s766_s11 = smov %s624_s5 }
  0xe5   : > { %s767_s12 = smov %s584_s18  ;;  %18 = sbr.rel (!%p16_p0) target bundleno = 6 (0x6), region = 79 }
  0xec   :  { %255 = vsyncpa [#allocation3], 1 }
  0xed   :  { %257 = vsyncpa [#allocation3 + $0x1], 1 }
  0xee   :  { %258 = vsyncpa [#allocation4], 1 }
  0xef   :  { %260 = vsyncpa [#allocation4 + $0x1], 1 }
  0xf0   :  { %261 = vsyncpa [#allocation5], 1 }
  0xf1   :  { %263 = vsyncpa [#allocation5 + $0x1], 1 }

</bundles_post_ra>
